<compile_context>
chip_gen: v5e
topology: v5e:2x2
jax: 0.10.0
libtpu: 0.0.40
codegen_flags: <defaults>
</compile_context>

<pallas_src>
import functools

import jax
import jax.numpy as jnp
from jax.experimental import pallas as pl
from jax.experimental.pallas import tpu as pltpu

WIDTH = 100         # hidden width from the PyTorch module
WIDTH_PAD = 128     # hidden width padded to a full lane width (zero-padded)
TM = 1024           # max batch tile (lane/N dim of both transposed matmuls)
SMALL_BATCH = 256   # below this, plain jnp beats the pallas_call fixed cost


def _round_up(x, m):
    return ((x + m - 1) // m) * m


def _fcnn_kernel(xt_ref, w1_ref, b1_ref, w2_ref, b2_ref, ot_ref):
    # xt_ref: (input_size, tm)       batch in the lane dim (lane-dense)
    # w1_ref: (WIDTH_PAD, input_size)  b1_ref: (WIDTH_PAD, 1)
    # w2_ref: (output_size, WIDTH_PAD) b2_ref: (output_size, 1)
    # ot_ref: (output_size, tm)      lane-dense output block
    h_t = jnp.dot(w1_ref[...], xt_ref[...],
                  preferred_element_type=jnp.float32)          # (128, tm)
    h_t = jnp.maximum(h_t + b1_ref[...], 0.0)                  # bias + relu, f32
    out_t = jnp.dot(w2_ref[...], h_t,
                    preferred_element_type=jnp.float32)        # (out, tm)
    ot_ref[...] = (out_t + b2_ref[...]).astype(ot_ref.dtype)


def prepare_params(w1, b1, w2, b2):
    """One-time weight prep (hoisted out of the per-call forward path).

    Keeps PyTorch (out_features, in_features) orientation -- exactly what the
    transposed dataflow wants -- and zero-pads the hidden width 100 -> 128.
    Padded hidden units see zero weight and zero bias (relu(0)=0) and their
    fc2 columns are zero, so the math is exactly unchanged.
    """
    width, input_size = w1.shape
    output_size = w2.shape[0]
    w1_p = jnp.zeros((WIDTH_PAD, input_size), w1.dtype).at[:width, :].set(w1)
    b1_p = jnp.zeros((WIDTH_PAD, 1), b1.dtype).at[:width, 0].set(b1)
    w2_p = jnp.zeros((output_size, WIDTH_PAD), w2.dtype).at[:, :width].set(w2)
    b2_p = b2.reshape(output_size, 1)
    return w1_p, b1_p, w2_p, b2_p


@functools.partial(jax.jit, static_argnames=("block_m",))
def _fcnn_pallas(x, w1_p, b1_p, w2_p, b2_p, block_m=TM):
    B, input_size = x.shape
    width_pad = w1_p.shape[0]
    output_size = w2_p.shape[0]

    # Batch tile = lane/N dim of both matmuls: keep it a multiple of 256
    # (also a multiple of 128, so fine on v5e) and cap it near ceil(B/2) so
    # mid-size batches still produce >=2 grid steps for the two v7x cores.
    tm = max(256, min(block_m, _round_up(pl.cdiv(B, 2), 256)))
    grid = (pl.cdiv(B, tm),)   # partial last block clipped by Pallas: no pad/slice

    # Feature-major x (layout plumbing, not compute): lane-dense (in, tm) blocks.
    x_t = x.T                   # (input_size, B)

    # Constant index_map -> Pallas re-uses the same VMEM block after step 0
    # (no per-step re-fetch of the resident weights/biases).
    resident = lambda shape: pl.BlockSpec(shape, lambda i: (0, 0))

    out_t = pl.pallas_call(
        _fcnn_kernel,
        out_shape=jax.ShapeDtypeStruct((output_size, B), x.dtype),
        grid_spec=pltpu.PrefetchScalarGridSpec(
            num_scalar_prefetch=0,
            grid=grid,
            in_specs=[
                pl.BlockSpec((input_size, tm), lambda i: (0, i)),  # streamed x_T
                resident((width_pad, input_size)),                 # W1_pad
                resident((width_pad, 1)),                          # b1
                resident((output_size, width_pad)),                # W2_pad
                resident((output_size, 1)),                        # b2
            ],
            out_specs=pl.BlockSpec((output_size, tm), lambda i: (0, i)),
        ),
        compiler_params=pltpu.CompilerParams(
            # batch tiles are independent -> shard across TensorCores on v7x
            dimension_semantics=("parallel",)),
    )(x_t, w1_p, b1_p, w2_p, b2_p)

    return out_t.T   # back to (B, output_size); tiny (4 x B) layout op


@jax.jit
def _fcnn_small(x, w1_p, b1_p, w2_p, b2_p):
    # Tiny-batch path: pallas_call fixed cost exceeds the compute; XLA fuses this.
    h = jnp.maximum(x @ w1_p.T + b1_p[:, 0], 0.0)
    return h @ w2_p.T + b2_p[:, 0]


def fcnn_forward(data, w1, b1, w2, b2, action_list=None, *, prepared=None):
    """Pallas implementation of FCNN.forward.

    data: (B, input_size) or (input_size,) float32
    w1:   (width, input_size)  b1: (width,)          (PyTorch nn.Linear layout)
    w2:   (output_size, width) b2: (output_size,)
    prepared: optional result of prepare_params(w1, b1, w2, b2).
    """
    if prepared is None:
        prepared = prepare_params(w1, b1, w2, b2)
    w1_p, b1_p, w2_p, b2_p = prepared

    squeeze = data.ndim == 1
    x = data[None, :] if squeeze else data
    B = x.shape[0]

    if B < SMALL_BATCH:
        out = _fcnn_small(x, w1_p, b1_p, w2_p, b2_p)
    else:
        out = _fcnn_pallas(x, w1_p, b1_p, w2_p, b2_p)

    if squeeze:
        out = out[0]

    if action_list is not None:
        # TODO(synk): fuse this gather into the kernel via scalar prefetch of
        # the per-row action indices (write a (B, 1) output directly) to skip
        # the extra HBM pass over the full (B, output_size) result.
        if out.ndim == 1:
            return out[action_list]                       # torch.gather(dim=0)
        return jnp.take_along_axis(out, action_list, axis=1)  # torch.gather(dim=1)
    return out


def make_params(input_size, output_size, dtype=jnp.float32):
    """Deterministic constant init, exactly as in FCNN.__init__."""
    w1 = jnp.full((WIDTH, input_size), 160.0 / WIDTH, dtype=dtype)
    b1 = jnp.full((WIDTH,), -0.1 / WIDTH, dtype=dtype)
    w2 = jnp.full((output_size, WIDTH), 1.0 / WIDTH, dtype=dtype)
    b2 = jnp.full((output_size,), -0.1 / WIDTH, dtype=dtype)
    return w1, b1, w2, b2


if __name__ == "__main__":
    input_size = 8
    output_size = 4

    w1, b1, w2, b2 = make_params(input_size, output_size)
    prepared = prepare_params(w1, b1, w2, b2)   # one-time weight prep

    def ref_fn(x):
        return jnp.maximum(x @ w1.T + b1, 0.0) @ w2.T + b2

    key = jax.random.PRNGKey(0)
    k1, k2, k3 = jax.random.split(key, 3)

    # Pallas path: B=1000 -> tm=512, grid=(2,), partial (clipped) last block.
    data_big = jax.random.normal(k1, (1000, input_size), dtype=jnp.float32)
    out_big = jax.block_until_ready(
        fcnn_forward(data_big, w1, b1, w2, b2, prepared=prepared))
    assert out_big.shape == (1000, output_size)
    assert jnp.allclose(out_big, ref_fn(data_big), atol=1e-4, rtol=1e-4)

    # Tiny batch (B=2): jnp dispatch path.
    data2 = jax.random.normal(k2, (2, input_size), dtype=jnp.float32)
    out2 = jax.block_until_ready(
        fcnn_forward(data2, w1, b1, w2, b2, prepared=prepared))
    assert out2.shape == (2, output_size)
    assert jnp.allclose(out2, ref_fn(data2), atol=1e-5, rtol=1e-5)

    # 1-D input path.
    out1d = jax.block_until_ready(
        fcnn_forward(data2[0], w1, b1, w2, b2, prepared=prepared))
    assert out1d.shape == (output_size,)
    assert jnp.allclose(out1d, ref_fn(data2[:1])[0], atol=1e-5, rtol=1e-5)

    # action_list gather (torch.gather(dim=1) semantics) on the Pallas path.
    actions = jax.random.randint(k3, (1000, 1), 0, output_size, dtype=jnp.int32)
    gathered = jax.block_until_ready(
        fcnn_forward(data_big, w1, b1, w2, b2, action_list=actions,
                     prepared=prepared))
    assert gathered.shape == (1000, 1)
    assert jnp.allclose(gathered[:, 0],
                        ref_fn(data_big)[jnp.arange(1000), actions[:, 0]],
                        atol=1e-4, rtol=1e-4)

    print("KERNEL_OK")
</pallas_src>

<mosaic_0001>
module attributes {stable_mosaic.version = 11 : i64} {
  func.func @_fcnn_kernel(%arg0: i32, %arg1: memref<8x512xf32, #tpu.memory_space<vmem>>, %arg2: memref<128x8xf32, #tpu.memory_space<vmem>>, %arg3: memref<128x1xf32, #tpu.memory_space<vmem>>, %arg4: memref<4x128xf32, #tpu.memory_space<vmem>>, %arg5: memref<4x1xf32, #tpu.memory_space<vmem>>, %arg6: memref<4x512xf32, #tpu.memory_space<vmem>>) attributes {dimension_semantics = [#tpu.dimension_semantics<parallel>], iteration_bounds = array<i64: 2>, scalar_prefetch = 0 : i64, scratch_operands = 0 : i64, tpu.core_type = #tpu.core_type<tc>, window_params = [{transform_indices = @transform_0, window_bounds = array<i64: 8, 512>}, {pipeline_mode = #tpu.pipeline_mode<synchronous>, transform_indices = @transform_1, window_bounds = array<i64: 128, 8>}, {pipeline_mode = #tpu.pipeline_mode<synchronous>, transform_indices = @transform_2, window_bounds = array<i64: 128, 1>}, {pipeline_mode = #tpu.pipeline_mode<synchronous>, transform_indices = @transform_3, window_bounds = array<i64: 4, 128>}, {pipeline_mode = #tpu.pipeline_mode<synchronous>, transform_indices = @transform_4, window_bounds = array<i64: 4, 1>}, {transform_indices = @transform_5, window_bounds = array<i64: 4, 512>}]} {
    %c0 = arith.constant 0 : index
    %c0_0 = arith.constant 0 : index
    %0 = vector.load %arg2[%c0, %c0_0] : memref<128x8xf32, #tpu.memory_space<vmem>>, vector<128x8xf32>
    %c0_1 = arith.constant 0 : index
    %c0_2 = arith.constant 0 : index
    %1 = vector.load %arg1[%c0_1, %c0_2] : memref<8x512xf32, #tpu.memory_space<vmem>>, vector<8x512xf32>
    %cst = arith.constant dense<0.000000e+00> : vector<128x512xf32>
    %2 = tpu.matmul %0, %1, %cst {dimension_numbers = #tpu.dot_dimension_numbers<[1], [0], [0], [1], [0, 0, 1, 1], [], []>} : vector<128x8xf32>, vector<8x512xf32>, vector<128x512xf32> -> vector<128x512xf32>
    %c0_3 = arith.constant 0 : index
    %c0_4 = arith.constant 0 : index
    %3 = vector.load %arg3[%c0_3, %c0_4] : memref<128x1xf32, #tpu.memory_space<vmem>>, vector<128x1xf32>
    %4 = vector.broadcast %3 : vector<128x1xf32> to vector<128x512xf32>
    %5 = arith.addf %2, %4 : vector<128x512xf32>
    %cst_5 = arith.constant 0.000000e+00 : f32
    %6 = vector.broadcast %cst_5 : f32 to vector<128x512xf32>
    %7 = arith.maximumf %5, %6 : vector<128x512xf32>
    %c0_6 = arith.constant 0 : index
    %c0_7 = arith.constant 0 : index
    %8 = vector.load %arg4[%c0_6, %c0_7] : memref<4x128xf32, #tpu.memory_space<vmem>>, vector<4x128xf32>
    %cst_8 = arith.constant dense<0.000000e+00> : vector<4x512xf32>
    %9 = tpu.matmul %8, %7, %cst_8 {dimension_numbers = #tpu.dot_dimension_numbers<[1], [0], [0], [1], [0, 0, 1, 1], [], []>} : vector<4x128xf32>, vector<128x512xf32>, vector<4x512xf32> -> vector<4x512xf32>
    %c0_9 = arith.constant 0 : index
    %c0_10 = arith.constant 0 : index
    %10 = vector.load %arg5[%c0_9, %c0_10] : memref<4x1xf32, #tpu.memory_space<vmem>>, vector<4x1xf32>
    %11 = vector.broadcast %10 : vector<4x1xf32> to vector<4x512xf32>
    %12 = arith.addf %9, %11 : vector<4x512xf32>
    %c0_11 = arith.constant 0 : index
    %c0_12 = arith.constant 0 : index
    %13 = vector.load %arg6[%c0_11, %c0_12] : memref<4x512xf32, #tpu.memory_space<vmem>>, vector<4x512xf32>
    tpu.vector_store %arg6[%c0_11, %c0_12], %12 {strides = array<i32>} : memref<4x512xf32, #tpu.memory_space<vmem>>, vector<4x512xf32>,
    return
  }
  func.func @transform_0(%arg0: i32) -> (i32, i32) {
    %c0_i32 = arith.constant 0 : i32
    %c0_i32_0 = arith.constant 0 : i32
    return %c0_i32, %arg0 : i32, i32
  }
  func.func @transform_1(%arg0: i32) -> (i32, i32) {
    %c0_i32 = arith.constant 0 : i32
    %c0_i32_0 = arith.constant 0 : i32
    %c0_i32_1 = arith.constant 0 : i32
    return %c0_i32, %c0_i32_0 : i32, i32
  }
  func.func @transform_2(%arg0: i32) -> (i32, i32) {
    %c0_i32 = arith.constant 0 : i32
    %c0_i32_0 = arith.constant 0 : i32
    %c0_i32_1 = arith.constant 0 : i32
    return %c0_i32, %c0_i32_0 : i32, i32
  }
  func.func @transform_3(%arg0: i32) -> (i32, i32) {
    %c0_i32 = arith.constant 0 : i32
    %c0_i32_0 = arith.constant 0 : i32
    %c0_i32_1 = arith.constant 0 : i32
    return %c0_i32, %c0_i32_0 : i32, i32
  }
  func.func @transform_4(%arg0: i32) -> (i32, i32) {
    %c0_i32 = arith.constant 0 : i32
    %c0_i32_0 = arith.constant 0 : i32
    %c0_i32_1 = arith.constant 0 : i32
    return %c0_i32, %c0_i32_0 : i32, i32
  }
  func.func @transform_5(%arg0: i32) -> (i32, i32) {
    %c0_i32 = arith.constant 0 : i32
    %c0_i32_0 = arith.constant 0 : i32
    return %c0_i32, %arg0 : i32, i32
  }
}

</mosaic_0001>

<bundles_post_ra>
// kernel: _fcnn_pallas.1
= control target key start
LH: loop header
LB: loop body
LE: loop exit
PB: predicated region body
PF: predicated region fallthrough
CT: control target
= control target key end

     0   :  { %10 = vsyncpa [#allocation3], 0  ;;  %s1553_s0 = inlined_call_operand.vmem [shape: f32[8,1000], index: 0, kind: input, shape index: {}]   ;;  %s1554_s1 = inlined_call_operand.vmem [shape: f32[128,8], index: 1, kind: input, shape index: {}]   ;;  %s1555_s2 = inlined_call_operand.vmem [shape: f32[128,1], index: 2, kind: input, shape index: {}]   ;;  %s1556_s3 = inlined_call_operand.vmem [shape: f32[4,128], index: 3, kind: input, shape index: {}]   ;;  %s1557_s4 = inlined_call_operand.vmem [shape: f32[4,1], index: 4, kind: input, shape index: {}]   ;;  %s1558_s5 = inlined_call_operand.hbm [shape: f32[4,1000], index: 5, kind: output, shape index: {}]  }
   0x1   :  { %12 = vsyncpa [#allocation3 + $0x1], 0  ;;  %s1106_s18 = smov 0   ;;  %s1108_s19 = smov 0  }
   0x2   :  { %s1110_s20 = smov 0   ;;  %s1112_s21 = smov 0  }
   0x3 LB: > { %s1127_s22 = sadd.s32 4294967295, %s1073_s21   ;;  %s891_s23 = sadd.s32 4294967294, %s1073_s21   ;;  %s1073_s21 = sphi %s1112_s21, %s1606_s21   ;;  %s1069_s20 = sphi %s1110_s20, %s1605_s20   ;;  %s1065_s19 = sphi %s1108_s19, %s1604_s19   ;;  %s1061_s18 = sphi %s1106_s18, %s1603_s18  }
   0x4   : > { %s1131_s24 = sadd.s32 1, %s1073_s21   ;;  %s135_s25 = sadd.s32 1, %s1069_s20 }
   0x5   : > { %s132_s26 = ssub.s32 %s1073_s21, %s1131_s24  ;;  %p145_p0 = scmp.ne.s32.totalorder %s1069_s20, %s1065_s19 }
   0x6   : > { %p133_p1 = scmp.eq.s32.totalorder %s132_s26, 0  ;;  %p146_p2 = scmp.eq.s32.totalorder %s1127_s22, 1 }
   0x7   : > { %p151_p3 = scmp.ne.s32.totalorder %s1065_s19, %s1061_s18  ;;  %p152_p4 = scmp.eq.s32.totalorder %s891_s23, 1 }
   0x8   : > { %s1142_s27 = scalar_select %p133_p1, %s1069_s20, %s135_s25  }
   0x9   : > { %p1144_p5 = por %p146_p2, %p145_p0  ;;  %p1148_p6 = por %p152_p4, %p151_p3 }
   0xa   : > { %p894_p7 = scmp.ge.s32.totalorder %s1073_s21, 1  ;;  %p191_p8 = scmp.lt.s32.totalorder %s1073_s21, 3 }
   0xc   : > { %p192_p9 = pnand %p894_p7, %p191_p8 }
   0xe   : > { %195 = sbr.rel (%p192_p9) target bundleno = 456 (0x1c8), region = 40 }
  0x13   : > { %v261_v0 = vld [vmem:[%s1555_s2 + $0x78] sm:$0xff]  ;;  %s896_s7 = sshll.u32 %s1127_s22, 2  ;;  %v1075_v1 = vmov 0   ;;  %v259_v2 = vld [vmem:[%s1555_s2 + $0x68] sm:$0xff]  ;;  %v226_v4 = vld [vmem:[%s1554_s1] sm:$0xff]  ;;  %vm342_vm0 = vcmask 64512  }
  0x14   : > { %1008 = vset.pattern.permute.xlu0 %v1075_v1  ;;  %p220_p10 = scmp.lt.s32.totalorder %s896_s7, 7  ;;  %1009 = vset.pattern.permute.xlu1 %v1075_v1  ;;  %v257_v3 = vld [vmem:[%s1555_s2 + $0x58] sm:$0xff]  ;;  %v260_v9 = vld [vmem:[%s1555_s2 + $0x70] sm:$0xff]  ;;  %v258_v10 = vld [vmem:[%s1555_s2 + $0x60] sm:$0xff]  ;;  %s216_s14 = sand.u32 1, %s1065_s19   ;;  %vm808_vm1 = vcmask 1043456  }
  0x15   : > { %339 = vperm.xlu0 %1008, %v261_v0   ;;  %329 = vperm.xlu1 %1009, %v259_v2   ;;  %v256_v11 = vld [vmem:[%s1555_s2 + $0x50] sm:$0xff]  ;;  %v227_v12 = vld [vmem:[%s1554_s1 + $0x8] sm:$0xff]  ;;  %v254_v14 = vld [vmem:[%s1555_s2 + $0x40] sm:$0xff]  ;;  %s967_s17 = sshll.u32 %s1127_s22, 4  ;;  %s1031_s11 = scalar_lea.hbm %s1558_s5, 32 }
  0x16   : > { %s1608_s7 = smov (!%p220_p10, %s896_s7), 7  ;;  %1010 = vset.pattern.permute.xlu2 %v1075_v1  ;;  %v255_v13 = vld [vmem:[%s1555_s2 + $0x48] sm:$0xff]  ;;  %v253_v15 = vld [vmem:[%s1555_s2 + $0x38] sm:$0xff]  ;;  %v228_v16 = vld [vmem:[%s1554_s1 + $0x10] sm:$0xff]  ;;  %s827_s26 = scalar_lea.hbm %s1558_s5, %s967_s17 }
  0x17   : > { %319 = vperm.xlu2 %1010, %v257_v3   ;;  %s897_s12 = sshll.u32 %s1608_s7, 3  ;;  %v252_v17 = vld [vmem:[%s1555_s2 + $0x30] sm:$0xff]  ;;  %v251_v18 = vld [vmem:[%s1555_s2 + $0x28] sm:$0xff]  ;;  %v250_v19 = vld [vmem:[%s1555_s2 + $0x20] sm:$0xff]  ;;  %s831_s6 = sshll.u32 %s827_s26, 4  ;;  %s832_s6 = int_to_ptr.hbm [resolvable:$true] %s831_s6 }
  0x18   : > { %s223_s15 = scalar_lea.vmem %s1553_s0, %s897_s12  ;;  %v229_v20 = vld [vmem:[%s1554_s1 + $0x18] sm:$0xff]  ;;  %v248_v22 = vld [vmem:[%s1555_s2 + $0x10] sm:$0xff]  ;;  %v247_v23 = vld [vmem:[%s1555_s2 + $0x8] sm:$0xff]  ;;  %s816_s7 = scalar_lea.sflag [#allocation3], %s216_s14 }
  0x19   : > { %v242_v5 = vld [vmem:[%s223_s15] sm:$0xff]  ;;  %v243_v6 = vld [vmem:[%s223_s15 + $0x8] sm:$0xff]  ;;  %v244_v7 = vld [vmem:[%s223_s15 + $0x10] sm:$0xff]  ;;  %s1025_s8 = sshra.s32 %s832_s6, 4  ;;  %s1026_s8 = int_to_ptr.hbm [resolvable:$true] %s1025_s8 }
  0x1a   : > { %406 = vmatpush.msra.mxu0 %v242_v5  ;;  %471 = vmatpush.msra.mxu1 %v243_v6  ;;  %v245_v8 = vld [vmem:[%s223_s15 + $0x18] sm:$0xff]  ;;  %v230_v24 = vld [vmem:[%s1554_s1 + $0x20] sm:$0xff]  ;;  %v231_v26 = vld [vmem:[%s1554_s1 + $0x28] sm:$0xff]  ;;  %s895_s15 = sshll.u32 %s216_s14, 4  ;;  %s1027_s22 = scalar_lea.hbm %s1026_s8, 16 }
  0x1b   : > { %536 = vmatpush.msra.mxu2 %v244_v7  ;;  %601 = vmatpush.msra.mxu3 %v245_v8  ;;  %v249_v21 = vld [vmem:[%s1555_s2 + $0x18] sm:$0xff]  ;;  %v246_v25 = vld [vmem:[%s1555_s2] sm:$0xff]  ;;  %v232_v27 = vld [vmem:[%s1554_s1 + $0x30] sm:$0xff]  ;;  %s218_s16 = scalar_lea.vmem [#allocation2], %s895_s15  ;;  %p1028_p11 = scmp.ne.s32.totalorder %s1026_s8, %s1027_s22 }
  0x1c   : > { %898 = vmatmul.msk.f32.vlgmr.msra.gmra.mxu0 %vm342_vm0, %v226_v4  ;;  %914 = vmatmul.msk.f32.vlgmr.msra.gmra.mxu1 %vm342_vm0, %v226_v4  ;;  %v233_v28 = vld [vmem:[%s1554_s1 + $0x38] sm:$0xff]  ;;  %v234_v29 = vld [vmem:[%s1554_s1 + $0x40] sm:$0xff]  ;;  %v235_v30 = vld [vmem:[%s1554_s1 + $0x48] sm:$0xff]  ;;  %s829_s30 = sshll.u32 %s218_s16, 4  ;;  %p1032_p0 = scmp.lt.s32.totalorder %s1026_s8, %s1558_s5  ;;  %s830_s30 = int_to_ptr.vmem [resolvable:$true] %s829_s30 }
  0x1d   : > { %930 = vmatmul.msk.f32.vlgmr.msra.gmra.mxu2 %vm342_vm0, %v226_v4  ;;  %946 = vmatmul.msk.f32.vlgmr.msra.gmra.mxu3 %vm342_vm0, %v226_v4  ;;  %v236_v31 = vld [vmem:[%s1554_s1 + $0x50] sm:$0xff]  ;;  %v237_v32 = vld [vmem:[%s1554_s1 + $0x58] sm:$0xff]  ;;  %v238_v33 = vld [vmem:[%s1554_s1 + $0x60] sm:$0xff]  ;;  %p1029_p12 = pnand %p1028_p11, %p1144_p5  ;;  %p1033_p1 = scmp.lt.s32.totalorder %s1031_s11, %s1027_s22 }
  0x1e   : > { %334 = vperm.xlu0 %1008, %v260_v9   ;;  %324 = vperm.xlu1 %1009, %v258_v10   ;;  %v716_v34 = vld [vmem:[%s1557_s4] sm:$0xf]  ;;  %v239_v35 = vld [vmem:[%s1554_s1 + $0x68] sm:$0xff]  ;;  %v240_v36 = vld [vmem:[%s1554_s1 + $0x70] sm:$0xff] }
  0x1f   : > { %314 = vperm.xlu2 %1010, %v256_v11   ;;  %v241_v37 = vld [vmem:[%s1554_s1 + $0x78] sm:$0xff]  ;;  %p1030_p13 = pneg %p1029_p12  ;;  %p1034_p2 = por %p1033_p1, %p1032_p0 }
  0x21   : > { %p1035_p3 = pnand %p1034_p2, %p1030_p13 }
  0x24   : > { %899 = vmatmul.msk.f32.gmra.mxu0 %vm342_vm0, %v227_v12  ;;  %915 = vmatmul.msk.f32.gmra.mxu1 %vm342_vm0, %v227_v12 }
  0x25   : > { %931 = vmatmul.msk.f32.gmra.mxu2 %vm342_vm0, %v227_v12  ;;  %947 = vmatmul.msk.f32.gmra.mxu3 %vm342_vm0, %v227_v12 }
  0x26   : > { %309 = vperm.xlu0 %1008, %v255_v13   ;;  %304 = vperm.xlu1 %1009, %v254_v14  }
  0x27   : > { %299 = vperm.xlu2 %1010, %v253_v15  }
  0x2c   : > { %900 = vmatmul.msk.f32.gmra.mxu0 %vm342_vm0, %v228_v16  ;;  %916 = vmatmul.msk.f32.gmra.mxu1 %vm342_vm0, %v228_v16 }
  0x2d   : > { %932 = vmatmul.msk.f32.gmra.mxu2 %vm342_vm0, %v228_v16  ;;  %948 = vmatmul.msk.f32.gmra.mxu3 %vm342_vm0, %v228_v16 }
  0x2e   : > { %294 = vperm.xlu0 %1008, %v252_v17   ;;  %289 = vperm.xlu1 %1009, %v251_v18  }
  0x2f   : > { %284 = vperm.xlu2 %1010, %v250_v19  }
  0x34   : > { %901 = vmatmul.msk.f32.gmra.mxu0 %vm342_vm0, %v229_v20  ;;  %917 = vmatmul.msk.f32.gmra.mxu1 %vm342_vm0, %v229_v20 }
  0x35   : > { %933 = vmatmul.msk.f32.gmra.mxu2 %vm342_vm0, %v229_v20  ;;  %949 = vmatmul.msk.f32.gmra.mxu3 %vm342_vm0, %v229_v20 }
  0x36   : > { %279 = vperm.xlu0 %1008, %v249_v21   ;;  %274 = vperm.xlu1 %1009, %v248_v22  }
  0x37   : > { %269 = vperm.xlu2 %1010, %v247_v23  }
  0x3c   : > { %902 = vmatmul.msk.f32.gmra.mxu0 %vm342_vm0, %v230_v24  ;;  %918 = vmatmul.msk.f32.gmra.mxu1 %vm342_vm0, %v230_v24 }
  0x3d   : > { %934 = vmatmul.msk.f32.gmra.mxu2 %vm342_vm0, %v230_v24  ;;  %950 = vmatmul.msk.f32.gmra.mxu3 %vm342_vm0, %v230_v24 }
  0x3e   : > { %264 = vperm.xlu0 %1008, %v246_v25   ;;  %719 = vperm.xlu1 %1009, %v716_v34  }
  0x44   : > { %903 = vmatmul.msk.f32.gmra.mxu0 %vm342_vm0, %v231_v26  ;;  %919 = vmatmul.msk.f32.gmra.mxu1 %vm342_vm0, %v231_v26 }
  0x45   : > { %935 = vmatmul.msk.f32.gmra.mxu2 %vm342_vm0, %v231_v26  ;;  %951 = vmatmul.msk.f32.gmra.mxu3 %vm342_vm0, %v231_v26 }
  0x4c   : > { %904 = vmatmul.msk.f32.gmra.mxu0 %vm342_vm0, %v232_v27  ;;  %920 = vmatmul.msk.f32.gmra.mxu1 %vm342_vm0, %v232_v27 }
  0x4d   : > { %936 = vmatmul.msk.f32.gmra.mxu2 %vm342_vm0, %v232_v27  ;;  %952 = vmatmul.msk.f32.gmra.mxu3 %vm342_vm0, %v232_v27 }
  0x54   : > { %905 = vmatmul.msk.f32.gmra.mxu0 %vm342_vm0, %v233_v28  ;;  %921 = vmatmul.msk.f32.gmra.mxu1 %vm342_vm0, %v233_v28 }
  0x55   : > { %937 = vmatmul.msk.f32.gmra.mxu2 %vm342_vm0, %v233_v28  ;;  %953 = vmatmul.msk.f32.gmra.mxu3 %vm342_vm0, %v233_v28 }
  0x5c   : > { %906 = vmatmul.msk.f32.gmra.mxu0 %vm342_vm0, %v234_v29  ;;  %922 = vmatmul.msk.f32.gmra.mxu1 %vm342_vm0, %v234_v29 }
  0x5d   : > { %938 = vmatmul.msk.f32.gmra.mxu2 %vm342_vm0, %v234_v29  ;;  %954 = vmatmul.msk.f32.gmra.mxu3 %vm342_vm0, %v234_v29 }
  0x64   : > { %907 = vmatmul.msk.f32.gmra.mxu0 %vm342_vm0, %v235_v30  ;;  %923 = vmatmul.msk.f32.gmra.mxu1 %vm342_vm0, %v235_v30 }
  0x65   : > { %939 = vmatmul.msk.f32.gmra.mxu2 %vm342_vm0, %v235_v30  ;;  %955 = vmatmul.msk.f32.gmra.mxu3 %vm342_vm0, %v235_v30 }
  0x6c   : > { %908 = vmatmul.msk.f32.gmra.mxu0 %vm342_vm0, %v236_v31  ;;  %924 = vmatmul.msk.f32.gmra.mxu1 %vm342_vm0, %v236_v31 }
  0x6d   : > { %940 = vmatmul.msk.f32.gmra.mxu2 %vm342_vm0, %v236_v31  ;;  %956 = vmatmul.msk.f32.gmra.mxu3 %vm342_vm0, %v236_v31 }
  0x71   : > { %v1411_v30 = vpop.permute.xlu2 %319 }
  0x74   : > { %909 = vmatmul.msk.f32.gmra.mxu0 %vm342_vm0, %v237_v32  ;;  %925 = vmatmul.msk.f32.gmra.mxu1 %vm342_vm0, %v237_v32 }
  0x75   : > { %941 = vmatmul.msk.f32.gmra.mxu2 %vm342_vm0, %v237_v32  ;;  %957 = vmatmul.msk.f32.gmra.mxu3 %vm342_vm0, %v237_v32 }
  0x7c   : > { %910 = vmatmul.msk.f32.gmra.mxu0 %vm342_vm0, %v238_v33  ;;  %926 = vmatmul.msk.f32.gmra.mxu1 %vm342_vm0, %v238_v33 }
  0x7d   : > { %942 = vmatmul.msk.f32.gmra.mxu2 %vm342_vm0, %v238_v33  ;;  %958 = vmatmul.msk.f32.gmra.mxu3 %vm342_vm0, %v238_v33 }
  0x84   : > { %911 = vmatmul.msk.f32.gmra.mxu0 %vm342_vm0, %v239_v35  ;;  %927 = vmatmul.msk.f32.gmra.mxu1 %vm342_vm0, %v239_v35 }
  0x85   : > { %943 = vmatmul.msk.f32.gmra.mxu2 %vm342_vm0, %v239_v35  ;;  %959 = vmatmul.msk.f32.gmra.mxu3 %vm342_vm0, %v239_v35 }
  0x87   : > { %v340_v20 = vpop.permute.xlu0 %339  ;;  %v330_v25 = vpop.permute.xlu1 %329 }
  0x8c   : > { %912 = vmatmul.msk.f32.gmra.mxu0 %vm342_vm0, %v240_v36  ;;  %928 = vmatmul.msk.f32.gmra.mxu1 %vm342_vm0, %v240_v36 }
  0x8d   : > { %944 = vmatmul.msk.f32.gmra.mxu2 %vm342_vm0, %v240_v36  ;;  %960 = vmatmul.msk.f32.gmra.mxu3 %vm342_vm0, %v240_v36 }
  0x90   : > { %v335_v31 = vpop.permute.xlu0 %334  ;;  %v325_v36 = vpop.permute.xlu1 %324 }
  0x94   : > { %913 = vmatmul.msk.f32.gmra.mxu0 %vm342_vm0, %v241_v37  ;;  %929 = vmatmul.msk.f32.gmra.mxu1 %vm342_vm0, %v241_v37 }
  0x95   : > { %945 = vmatmul.msk.f32.gmra.mxu2 %vm342_vm0, %v241_v37  ;;  %961 = vmatmul.msk.f32.gmra.mxu3 %vm342_vm0, %v241_v37  ;;  %v1413_v37 = vpop.permute.xlu2 %314 }
  0x99   : > { %v1321_v38 = vpop.f32.mrf.mxu0  ;;  %v1323_v39 = vpop.f32.mrf.mxu1 }
  0x9a   : > { %1561 = vst [vmem:[#allocation5_spill] sm:$0xff] %v1321_v38 }
  0x9b   : > { %1562 = vst [vmem:[#allocation6_spill] sm:$0xff] %v1323_v39 }
  0xa0   : > { %v1325_v40 = vpop.f32.mrf.mxu2  ;;  %v1327_v41 = vpop.f32.mrf.mxu3 }
  0xa1   : > { %1563 = vst [vmem:[#allocation7_spill] sm:$0xff] %v1325_v40  ;;  %v1329_v42 = vpop.f32.mrf.mxu0  ;;  %v1331_v43 = vpop.f32.mrf.mxu1 }
  0xa2   : > { %1564 = vst [vmem:[#allocation8_spill] sm:$0xff] %v1327_v41  ;;  %v1415_v41 = vpop.permute.xlu0 %309 }
  0xa3   : > { %1565 = vst [vmem:[#allocation9_spill] sm:$0xff] %v1329_v42 }
  0xa4   : > { %1566 = vst [vmem:[#allocation10_spill] sm:$0xff] %v1331_v43  ;;  %v1417_v43 = vpop.permute.xlu1 %304 }
  0xa8   : > { %v1333_v44 = vpop.f32.mrf.mxu2  ;;  %v1335_v45 = vpop.f32.mrf.mxu3 }
  0xa9   : > { %1567 = vst [vmem:[#allocation11_spill] sm:$0xff] %v1333_v44  ;;  %v1337_v46 = vpop.f32.mrf.mxu0  ;;  %v1339_v47 = vpop.f32.mrf.mxu1 }
  0xaa   : > { %1568 = vst [vmem:[#allocation12_spill] sm:$0xff] %v1335_v45 }
  0xab   : > { %1569 = vst [vmem:[#allocation13_spill] sm:$0xff] %v1337_v46  ;;  %v1421_v46 = vpop.permute.xlu0 %294 }
  0xac   : > { %1570 = vst [vmem:[#allocation14_spill] sm:$0xff] %v1339_v47 }
  0xb0   : > { %v1341_v48 = vpop.f32.mrf.mxu2  ;;  %v1343_v49 = vpop.f32.mrf.mxu3 }
  0xb1   : > { %1571 = vst [vmem:[#allocation15_spill] sm:$0xff] %v1341_v48  ;;  %v1345_v50 = vpop.f32.mrf.mxu0  ;;  %v1347_v51 = vpop.f32.mrf.mxu1 }
  0xb2   : > { %1572 = vst [vmem:[#allocation16_spill] sm:$0xff] %v1343_v49 }
  0xb3   : > { %1573 = vst [vmem:[#allocation17_spill] sm:$0xff] %v1347_v51 }
  0xb8   : > { %v1349_v52 = vpop.f32.mrf.mxu2  ;;  %v1351_v53 = vpop.f32.mrf.mxu3 }
  0xb9   : > { %1574 = vst [vmem:[#allocation18_spill] sm:$0xff] %v1349_v52  ;;  %v1353_v54 = vpop.f32.mrf.mxu0  ;;  %v1355_v55 = vpop.f32.mrf.mxu1 }
  0xba   : > { %1575 = vst [vmem:[#allocation19_spill] sm:$0xff] %v1351_v53 }
  0xc0   : > { %v1357_v56 = vpop.f32.mrf.mxu2  ;;  %v1359_v57 = vpop.f32.mrf.mxu3 }
  0xc1   : > { %1576 = vst [vmem:[#allocation20_spill] sm:$0xff] %v1357_v56  ;;  %v1361_v58 = vpop.f32.mrf.mxu0  ;;  %v1363_v59 = vpop.f32.mrf.mxu1 }
  0xc2   : > { %1577 = vst [vmem:[#allocation21_spill] sm:$0xff] %v1359_v57 }
  0xc8   : > { %v1365_v60 = vpop.f32.mrf.mxu2  ;;  %v1367_v61 = vpop.f32.mrf.mxu3 }
  0xc9   : > { %1578 = vst [vmem:[#allocation22_spill] sm:$0xff] %v1365_v60  ;;  %v1369_v62 = vpop.f32.mrf.mxu0  ;;  %v1371_v63 = vpop.f32.mrf.mxu1 }
  0xca   : > { %1579 = vst [vmem:[#allocation23_spill] sm:$0xff] %v1367_v61  ;;  %v1419_v60 = vpop.permute.xlu2 %299 }
  0xd0   : > { %v1373_v0 = vpop.f32.mrf.mxu2  ;;  %v1375_v1 = vpop.f32.mrf.mxu3 }
  0xd1   : > { %1580 = vst [vmem:[#allocation24_spill] sm:$0xff] %v1373_v0  ;;  %v1377_v2 = vpop.f32.mrf.mxu0  ;;  %v1379_v3 = vpop.f32.mrf.mxu1 }
  0xd2   : > { %1581 = vst [vmem:[#allocation25_spill] sm:$0xff] %v1375_v1 }
  0xd8   : > { %v1381_v4 = vpop.f32.mrf.mxu2  ;;  %v1383_v5 = vpop.f32.mrf.mxu3 }
  0xd9   : > { %v1385_v6 = vpop.f32.mrf.mxu0  ;;  %v1387_v7 = vpop.f32.mrf.mxu1 }
  0xe0   : > { %v1389_v8 = vpop.f32.mrf.mxu2  ;;  %v1391_v9 = vpop.f32.mrf.mxu3 }
  0xe1   : > { %v1393_v10 = vpop.f32.mrf.mxu0  ;;  %v1395_v11 = vpop.f32.mrf.mxu1 }
  0xe8   : > { %v1397_v12 = vpop.f32.mrf.mxu2  ;;  %v1399_v13 = vpop.f32.mrf.mxu3 }
  0xe9   : > { %v438_v14 = vpop.f32.mrf.mxu0  ;;  %v503_v15 = vpop.f32.mrf.mxu1 }
  0xf0   : > { %v1401_v16 = vpop.f32.mrf.mxu2  ;;  %v1403_v17 = vpop.f32.mrf.mxu3 }
  0xf1   : > { %v441_v18 = vpop.f32.mrf.mxu0  ;;  %v506_v19 = vpop.f32.mrf.mxu1 }
  0xf8   : > { %v1405_v21 = vpop.f32.mrf.mxu2  ;;  %v1407_v22 = vpop.f32.mrf.mxu3 }
  0xf9   : > { %v444_v23 = vpop.f32.mrf.mxu0  ;;  %v509_v24 = vpop.f32.mrf.mxu1 }
  0xfa   : > { %v445_v61 = vadd.f32 %v444_v23, %v325_v36  ;;  %v510_v1 = vadd.f32 %v509_v24, %v325_v36 }
 0x100   : > { %v574_v26 = vpop.f32.mrf.mxu2  ;;  %v1409_v27 = vpop.f32.mrf.mxu3 }
 0x101   : > { %v447_v28 = vpop.f32.mrf.mxu0  ;;  %v512_v29 = vpop.f32.mrf.mxu1 }
 0x102   : > { %v448_v38 = vadd.f32 %v447_v28, %v330_v25  ;;  %v513_v56 = vadd.f32 %v512_v29, %v330_v25 }
 0x104   : > { %v704_v28 = vmax.f32 %v513_v56, 0.0 }
 0x108   : > { %v577_v32 = vpop.f32.mrf.mxu2  ;;  %v642_v33 = vpop.f32.mrf.mxu3 }
 0x109   : > { %v450_v34 = vpop.f32.mrf.mxu0  ;;  %v515_v35 = vpop.f32.mrf.mxu1 }
 0x10a   : > { %v451_v49 = vadd.f32 %v450_v34, %v335_v31  ;;  %v516_v39 = vadd.f32 %v515_v35, %v335_v31  ;;  %v703_v34 = vmax.f32 %v448_v38, 0.0 }
 0x10c   : > { %v707_v47 = vmax.f32 %v451_v49, 0.0  ;;  %v708_v0 = vmax.f32 %v516_v39, 0.0  ;;  %v439_v49 = vadd.f32 %v438_v14, %v1413_v37  ;;  %v504_v39 = vadd.f32 %v503_v15, %v1413_v37 }
 0x10e   : > { %v691_v15 = vmax.f32 %v439_v49, 0.0 }
 0x110   : > { %v580_v40 = vpop.f32.mrf.mxu2  ;;  %v645_v45 = vpop.f32.mrf.mxu3 }
 0x111   : > { %v453_v44 = vpop.f32.mrf.mxu0  ;;  %v518_v53 = vpop.f32.mrf.mxu1  ;;  %v581_v29 = vadd.f32 %v580_v40, %v335_v31  ;;  %v646_v35 = vadd.f32 %v645_v45, %v335_v31  ;;  %v643_v40 = vadd.f32 %v642_v33, %v330_v25  ;;  %v575_v45 = vadd.f32 %v574_v26, %v325_v36 }
 0x112   : > { %v454_v48 = vadd.f32 %v453_v44, %v340_v20  ;;  %v519_v52 = vadd.f32 %v518_v53, %v340_v20  ;;  %v442_v44 = vadd.f32 %v441_v18, %v1411_v30  ;;  %v578_v18 = vadd.f32 %v577_v32, %v330_v25  ;;  %v1444_v33 = vpop.permute.xlu2 %284 }
 0x113   : > { %v709_v14 = vmax.f32 %v581_v29, 0.0  ;;  %v710_v24 = vmax.f32 %v646_v35, 0.0  ;;  %v572_v25 = vadd.f32 %v1405_v21, %v1411_v30  ;;  %v706_v32 = vmax.f32 %v643_v40, 0.0 }
 0x114   : > { %v711_v57 = vmax.f32 %v454_v48, 0.0  ;;  %v712_v42 = vmax.f32 %v519_v52, 0.0  ;;  %v507_v48 = vadd.f32 %v506_v19, %v1411_v30  ;;  %v695_v56 = vmax.f32 %v442_v44, 0.0 }
 0x115   : > { %v705_v26 = vmax.f32 %v578_v18, 0.0  ;;  %v495_v21 = vadd.f32 %v1379_v3, %v1419_v60  ;;  %v569_v44 = vadd.f32 %v1401_v16, %v1413_v37  ;;  %v492_v3 = vadd.f32 %v1371_v63, %v1421_v46 }
 0x116   : > { %722 = vmatpush.msrb.mxu0 %v711_v57  ;;  %742 = vmatpush.msrb.mxu1 %v712_v42  ;;  %v699_v57 = vmax.f32 %v445_v61, 0.0  ;;  %v700_v42 = vmax.f32 %v510_v1, 0.0  ;;  %v696_v61 = vmax.f32 %v507_v48, 0.0  ;;  %v433_v1 = vadd.f32 %v1385_v6, %v1417_v43 }
 0x117   : > { %v430_v6 = vadd.f32 %v1377_v2, %v1419_v60  ;;  %v427_v2 = vadd.f32 %v1369_v62, %v1421_v46  ;;  %v566_v16 = vadd.f32 %v1397_v12, %v1415_v41  ;;  %v563_v12 = vadd.f32 %v1389_v8, %v1417_v43 }
 0x118   : > { %v583_v53 = vpop.f32.mrf.mxu2  ;;  %723 = vmatpush.msrb.mxu0 %v707_v47  ;;  %v648_v23 = vpop.f32.mrf.mxu3  ;;  %743 = vmatpush.msrb.mxu1 %v708_v0  ;;  %v436_v47 = vadd.f32 %v1393_v10, %v1415_v41  ;;  %v501_v0 = vadd.f32 %v1395_v11, %v1415_v41  ;;  %v692_v11 = vmax.f32 %v504_v39, 0.0  ;;  %v560_v8 = vadd.f32 %v1381_v4, %v1419_v60  ;;  %v1583_v4 = vld [vmem:[#allocation24_spill] sm:$0xff] }
 0x119   : > { %v584_v52 = vadd.f32 %v583_v53, %v340_v20  ;;  %v649_v51 = vadd.f32 %v648_v23, %v340_v20  ;;  %v640_v20 = vadd.f32 %v1409_v27, %v325_v36  ;;  %v1434_v10 = vpop.permute.xlu1 %289  ;;  %v637_v27 = vadd.f32 %v1407_v22, %v1411_v30 }
 0x11a   : > { %724 = vmatpush.msrb.mxu0 %v703_v34  ;;  %744 = vmatpush.msrb.mxu1 %v704_v28  ;;  %v687_v31 = vmax.f32 %v436_v47, 0.0  ;;  %v688_v36 = vmax.f32 %v501_v0, 0.0  ;;  %v701_v34 = vmax.f32 %v575_v45, 0.0  ;;  %v683_v22 = vmax.f32 %v433_v1, 0.0  ;;  %v1586_v1 = vld [vmem:[#allocation22_spill] sm:$0xff] }
 0x11b   : > { %v713_v38 = vmax.f32 %v584_v52, 0.0  ;;  %v714_v19 = vmax.f32 %v649_v51, 0.0  ;;  %v498_v51 = vadd.f32 %v1387_v7, %v1417_v43  ;;  %v1446_v7 = vpop.permute.xlu0 %279  ;;  %v634_v30 = vadd.f32 %v1403_v17, %v1413_v37 }
 0x11c   : > { %725 = vmatpush.msrb.mxu0 %v699_v57  ;;  %745 = vmatpush.msrb.mxu1 %v700_v42  ;;  %v702_v53 = vmax.f32 %v640_v20, 0.0  ;;  %v697_v28 = vmax.f32 %v572_v25, 0.0  ;;  %v424_v62 = vadd.f32 %v1361_v58, %v1434_v10  ;;  %v679_v29 = vmax.f32 %v430_v6, 0.0  ;;  %v1589_v6 = vld [vmem:[#allocation9_spill] sm:$0xff] }
 0x11d   : > { %762 = vmatpush.msrb.mxu2 %v713_v38  ;;  %782 = vmatpush.msrb.mxu3 %v714_v19  ;;  %v684_v48 = vmax.f32 %v498_v51, 0.0  ;;  %v631_v17 = vadd.f32 %v1399_v13, %v1415_v41  ;;  %v698_v37 = vmax.f32 %v637_v27, 0.0  ;;  %v489_v63 = vadd.f32 %v1363_v59, %v1434_v10 }
 0x11e   : > { %726 = vmatpush.msrb.mxu0 %v695_v56  ;;  %746 = vmatpush.msrb.mxu1 %v696_v61  ;;  %v680_v52 = vmax.f32 %v495_v21, 0.0  ;;  %v693_v23 = vmax.f32 %v569_v44, 0.0  ;;  %v421_v58 = vadd.f32 %v1353_v54, %v1444_v33  ;;  %v675_v49 = vmax.f32 %v427_v2, 0.0  ;;  %v270_v61 = vpop.permute.xlu2 %269  ;;  %v1591_v44 = vld [vmem:[#allocation10_spill] sm:$0xff]  ;;  %v1592_v2 = vld [vmem:[#allocation21_spill] sm:$0xff] }
 0x11f   : > { %763 = vmatpush.msrb.mxu2 %v709_v14  ;;  %783 = vmatpush.msrb.mxu3 %v710_v24  ;;  %v628_v41 = vadd.f32 %v1391_v9, %v1417_v43  ;;  %v694_v13 = vmax.f32 %v634_v30, 0.0  ;;  %v486_v59 = vadd.f32 %v1355_v55, %v1444_v33  ;;  %v676_v57 = vmax.f32 %v492_v3, 0.0  ;;  %v1582_v55 = vld [vmem:[#allocation17_spill] sm:$0xff]  ;;  %v1587_v24 = vld [vmem:[#allocation14_spill] sm:$0xff] }
 0x120   : > { %727 = vmatpush.msrb.mxu0 %v691_v15  ;;  %747 = vmatpush.msrb.mxu1 %v692_v11  ;;  %v689_v35 = vmax.f32 %v566_v16, 0.0  ;;  %v418_v54 = vadd.f32 %v1345_v50, %v1446_v7  ;;  %v671_v39 = vmax.f32 %v424_v62, 0.0  ;;  %v625_v43 = vadd.f32 %v1383_v5, %v1419_v60  ;;  %v1584_v50 = vld [vmem:[#allocation25_spill] sm:$0xff] }
 0x121   : > { %764 = vmatpush.msrb.mxu2 %v705_v26  ;;  %784 = vmatpush.msrb.mxu3 %v706_v32  ;;  %v690_v9 = vmax.f32 %v631_v17, 0.0  ;;  %v275_v42 = vpop.permute.xlu1 %274  ;;  %v483_v18 = vadd.f32 %v1582_v55, %v1446_v7  ;;  %v672_v38 = vmax.f32 %v489_v63, 0.0  ;;  %v557_v47 = vadd.f32 %v1583_v4, %v1421_v46  ;;  %v1585_v60 = vld [vmem:[#allocation13_spill] sm:$0xff]  ;;  %v1590_v32 = vld [vmem:[#allocation20_spill] sm:$0xff] }
 0x122   : > { %728 = vmatpush.msrb.mxu0 %v687_v31  ;;  %748 = vmatpush.msrb.mxu1 %v688_v36  ;;  %v685_v56 = vmax.f32 %v563_v12, 0.0  ;;  %v667_v40 = vmax.f32 %v421_v58, 0.0  ;;  %v622_v19 = vadd.f32 %v1584_v50, %v1421_v46  ;;  %v686_v0 = vmax.f32 %v628_v41, 0.0  ;;  %v1588_v46 = vld [vmem:[#allocation23_spill] sm:$0xff]  ;;  %v1598_v41 = vld [vmem:[#allocation16_spill] sm:$0xff] }
 0x123   : > { %765 = vmatpush.msrb.mxu2 %v701_v34  ;;  %785 = vmatpush.msrb.mxu3 %v702_v53  ;;  %v415_v5 = vadd.f32 %v1585_v60, %v275_v42  ;;  %v1487_v45 = vpop.permute.xlu0 %264  ;;  %v668_v14 = vmax.f32 %v486_v59, 0.0  ;;  %v554_v15 = vadd.f32 %v1586_v1, %v1434_v10  ;;  %v681_v20 = vmax.f32 %v560_v8, 0.0  ;;  %v1593_v53 = vld [vmem:[#allocation5_spill] sm:$0xff]  ;;  %v1597_v12 = vld [vmem:[#allocation15_spill] sm:$0xff] }
 0x124   : > { %729 = vmatpush.msrb.mxu0 %v683_v22  ;;  %749 = vmatpush.msrb.mxu1 %v684_v48  ;;  %v480_v51 = vadd.f32 %v1587_v24, %v275_v42  ;;  %v663_v11 = vmax.f32 %v418_v54, 0.0  ;;  %v619_v25 = vadd.f32 %v1588_v46, %v1434_v10  ;;  %v682_v26 = vmax.f32 %v625_v43, 0.0  ;;  %v1594_v48 = vld [vmem:[#allocation18_spill] sm:$0xff]  ;;  %v1599_v8 = vld [vmem:[#allocation11_spill] sm:$0xff]  ;;  %v1600_v43 = vld [vmem:[#allocation12_spill] sm:$0xff] }
 0x125   : > { %766 = vmatpush.msrb.mxu2 %v697_v28  ;;  %786 = vmatpush.msrb.mxu3 %v698_v37  ;;  %v412_v31 = vadd.f32 %v1589_v6, %v270_v61  ;;  %v664_v27 = vmax.f32 %v483_v18, 0.0  ;;  %v551_v21 = vadd.f32 %v1590_v32, %v1444_v33  ;;  %v677_v36 = vmax.f32 %v557_v47, 0.0  ;;  %v1596_v37 = vld [vmem:[#allocation19_spill] sm:$0xff]  ;;  %v1602_v47 = vld [vmem:[#allocation8_spill] sm:$0xff] }
 0x126   : > { %730 = vmatpush.msrb.mxu0 %v679_v29  ;;  %750 = vmatpush.msrb.mxu1 %v680_v52  ;;  %v477_v34 = vadd.f32 %v1591_v44, %v270_v61  ;;  %v616_v22 = vadd.f32 %v1592_v2, %v1444_v33  ;;  %v678_v30 = vmax.f32 %v622_v19, 0.0  ;;  %v659_v10 = vmax.f32 %v415_v5, 0.0  ;;  %v1595_v29 = vld [vmem:[#allocation6_spill] sm:$0xff]  ;;  %v1601_v18 = vld [vmem:[#allocation7_spill] sm:$0xff] }
 0x127   : > { %767 = vmatpush.msrb.mxu2 %v693_v23  ;;  %787 = vmatpush.msrb.mxu3 %v694_v13  ;;  %v409_v3 = vadd.f32 %v1593_v53, %v1487_v45  ;;  %v548_v16 = vadd.f32 %v1594_v48, %v1446_v7  ;;  %v673_v28 = vmax.f32 %v554_v15, 0.0  ;;  %v660_v62 = vmax.f32 %v480_v51, 0.0 }
 0x128   : > { %731 = vmatpush.msrb.mxu0 %v675_v49  ;;  %751 = vmatpush.msrb.mxu1 %v676_v57  ;;  %v474_v17 = vadd.f32 %v1595_v29, %v1487_v45  ;;  %v613_v33 = vadd.f32 %v1596_v37, %v1446_v7  ;;  %v674_v63 = vmax.f32 %v619_v25, 0.0  ;;  %v655_v52 = vmax.f32 %v412_v31, 0.0 }
 0x129   : > { %768 = vmatpush.msrb.mxu2 %v689_v35  ;;  %788 = vmatpush.msrb.mxu3 %v690_v9  ;;  %v545_v23 = vadd.f32 %v1597_v12, %v275_v42  ;;  %v669_v58 = vmax.f32 %v551_v21, 0.0  ;;  %v656_v49 = vmax.f32 %v477_v34, 0.0  ;;  %v610_v13 = vadd.f32 %v1598_v41, %v275_v42  ;;  %v720_v60 = vpop.permute.xlu1 %719 }
 0x12a   : > { %732 = vmatpush.msrb.mxu0 %v671_v39  ;;  %752 = vmatpush.msrb.mxu1 %v672_v38  ;;  %v670_v59 = vmax.f32 %v616_v22, 0.0  ;;  %v651_v57 = vmax.f32 %v409_v3, 0.0  ;;  %v542_v35 = vadd.f32 %v1599_v8, %v270_v61  ;;  %v665_v54 = vmax.f32 %v548_v16, 0.0  ;;  %v715_v39 = vld [vmem:[%s1556_s3] sm:$0xf] }
 0x12b   : > { %769 = vmatpush.msrb.mxu2 %v685_v56  ;;  %789 = vmatpush.msrb.mxu3 %v686_v0  ;;  %v652_v7 = vmax.f32 %v474_v17, 0.0  ;;  %v607_v9 = vadd.f32 %v1600_v43, %v270_v61  ;;  %v666_v55 = vmax.f32 %v613_v33, 0.0  ;;  %v661_v42 = vmax.f32 %v545_v23, 0.0 }
 0x12c   : > { %733 = vmatpush.msrb.mxu0 %v667_v40  ;;  %753 = vmatpush.msrb.mxu1 %v668_v14  ;;  %v539_v38 = vadd.f32 %v1601_v18, %v1487_v45  ;;  %v662_v4 = vmax.f32 %v610_v13, 0.0  ;;  %v604_v56 = vadd.f32 %v1602_v47, %v1487_v45  ;;  %v657_v40 = vmax.f32 %v542_v35, 0.0 }
 0x12d   : > { %770 = vmatpush.msrb.mxu2 %v681_v20  ;;  %790 = vmatpush.msrb.mxu3 %v682_v26  ;;  %v658_v50 = vmax.f32 %v607_v9, 0.0 }
 0x12e   : > { %734 = vmatpush.msrb.mxu0 %v663_v11  ;;  %754 = vmatpush.msrb.mxu1 %v664_v27  ;;  %v653_v19 = vmax.f32 %v539_v38, 0.0  ;;  %v654_v0 = vmax.f32 %v604_v56, 0.0 }
 0x12f   : > { %771 = vmatpush.msrb.mxu2 %v677_v36  ;;  %791 = vmatpush.msrb.mxu3 %v678_v30 }
 0x130   : > { %735 = vmatpush.msrb.mxu0 %v659_v10  ;;  %755 = vmatpush.msrb.mxu1 %v660_v62 }
 0x131   : > { %772 = vmatpush.msrb.mxu2 %v673_v28  ;;  %792 = vmatpush.msrb.mxu3 %v674_v63 }
 0x132   : > { %736 = vmatpush.msrb.mxu0 %v655_v52  ;;  %756 = vmatpush.msrb.mxu1 %v656_v49 }
 0x133   : > { %773 = vmatpush.msrb.mxu2 %v669_v58  ;;  %793 = vmatpush.msrb.mxu3 %v670_v59 }
 0x134   : > { %737 = vmatpush.msrb.mxu0 %v651_v57  ;;  %757 = vmatpush.msrb.mxu1 %v652_v7 }
 0x135   : > { %774 = vmatpush.msrb.mxu2 %v665_v54  ;;  %794 = vmatpush.msrb.mxu3 %v666_v55 }
 0x136   : > { %738 = vmatmul.f32.vlgmr.msrb.gmra.mxu0 %v715_v39  ;;  %758 = vmatmul.f32.vlgmr.msrb.gmra.mxu1 %v715_v39 }
 0x137   : > { %775 = vmatpush.msrb.mxu2 %v661_v42  ;;  %795 = vmatpush.msrb.mxu3 %v662_v4 }
 0x139   : > { %776 = vmatpush.msrb.mxu2 %v657_v40  ;;  %796 = vmatpush.msrb.mxu3 %v658_v50 }
 0x13b   : > { %777 = vmatpush.msrb.mxu2 %v653_v19  ;;  %797 = vmatpush.msrb.mxu3 %v654_v0 }
 0x13c   : > { %778 = vmatmul.f32.vlgmr.msrb.gmra.mxu2 %v715_v39  ;;  %798 = vmatmul.f32.vlgmr.msrb.gmra.mxu3 %v715_v39 }
 0x1b3   : > { %v739_v5 = vpop.f32.mrf.mxu0  ;;  %v759_v61 = vpop.f32.mrf.mxu1 }
 0x1b4   : > { %v760_v45 = vadd.f32 %v759_v61, %v720_v60  ;;  %v740_v14 = vadd.f32 %v739_v5, %v720_v60 }
 0x1b6   : > { %v806_v1 = vrot.slane %v760_v45, 4 }
 0x1b8   : > { %v809_v15 = vsel %vm808_vm1, %v740_v14, %v806_v1 }
 0x1b9   : > { %813 = vst [vmem:[%s218_s16] sm:$0xff] %v809_v15 }
 0x1bf   : > { %v779_v20 = vpop.f32.mrf.mxu2  ;;  %v799_v24 = vpop.f32.mrf.mxu3 }
 0x1c0   : > { %v800_v51 = vadd.f32 %v799_v24, %v720_v60  ;;  %v780_v11 = vadd.f32 %v779_v20, %v720_v60 }
 0x1c2   : > { %v807_v46 = vrot.slane %v800_v51, 4 }
 0x1c4   : > { %v810_v25 = vsel %vm808_vm1, %v780_v11, %v807_v46 }
 0x1c5   : > { %814 = vst [vmem:[%s218_s16 + $0x8] sm:$0xff] %v810_v25 }
 0x1c6   : > { %1038 = shalt.err (!%p1035_p3)
}
 0x1c7   : > { %968 = dma.vmem_to_hbm [thread:$0]  (%p1144_p5), %s830_s30, 256, %s832_s6, %s816_s7  }
 0x1c8 PF: > { %p974_p4 = scmp.ge.s32.totalorder %s1073_s21, 2  ;;  %s843_s14 = sand.u32 1, %s1061_s18  }
 0x1c9   : > { %s844_s15 = scalar_lea.sflag [#allocation3], %s843_s14 }
 0x1ca   : > { %p971_p7 = pnand %p974_p4, %p1148_p6 }
 0x1cc   : > { %p972_p8 = pneg %p971_p7 }
 0x1ce   : > { %1056 = dma.done.wait (%p972_p8), %s844_s15, 256  }
 0x1cf   : > { %1058 = vsyncadd (%p972_p8), %s844_s15, 4294967040  ;;  %p15_p9 = scmp.ge.s32.totalorder %s1131_s24, 4   ;;  %s1603_s18 = smov %s1065_s19 }
 0x1d0   : > { %s1604_s19 = smov %s1069_s20  ;;  %s1605_s20 = smov %s1142_s27 }
 0x1d1   : > { %s1606_s21 = smov %s1131_s24  ;;  %17 = sbr.rel (!%p15_p9) target bundleno = 3 (0x3), region = 75 }
 0x1d6   :  { %850 = vsyncpa [#allocation3], 1 }
 0x1d7   :  { %852 = vsyncpa [#allocation3 + $0x1], 1 }

</bundles_post_ra>
